<compile_context>
chip_gen: v7x
topology: tpu7x:2x2x1
jax: 0.10.0
libtpu: 0.0.40
codegen_flags: <defaults>
</compile_context>

<pallas_src>
import functools

import jax
import jax.numpy as jnp
from jax.experimental import pallas as pl
from jax.experimental.pallas import tpu as pltpu

FEATURE_DIM = 512
_LANE = 128            # class axis padded to a multiple of the 128-wide lane dim
_SUBLANE = 16          # bf16 sublane packing: batch tiles rounded to this
_VMEM_LIMIT = 32 * 1024 * 1024


def _round_up(x, m):
    return ((x + m - 1) // m) * m


def _classifier_head_kernel(f_ref, w_ref, b_ref, o_ref):
    """Linear(512, C_pad) + row-wise softmax for one batch tile.

    f_ref: (TB, 512)    features (any float dtype; cast to bf16 in VMEM)
    w_ref: (512, C_pad) bf16 head weight (VMEM-resident across batch tiles)
    b_ref: (1, C_pad)   f32 head bias (-1e30 on padded classes)
    o_ref: (TB, C_pad)  probabilities
    """
    feats = f_ref[...].astype(jnp.bfloat16)          # no-op when already bf16
    logits = jnp.dot(feats, w_ref[...], preferred_element_type=jnp.float32)
    logits = logits + b_ref[...]                     # bias stays f32 (pad sentinel)
    # numerically-stable softmax over the class (lane) axis, all math in f32.
    m = jnp.max(logits, axis=1, keepdims=True)
    e = jnp.exp(logits - m)
    denom = jnp.sum(e, axis=1, keepdims=True)
    # exact reciprocal: kernel is HBM-bound so it costs nothing, and rows sum
    # to 1 at f32 accuracy before the (optional) bf16 output cast.
    o_ref[...] = (e * pl.reciprocal(denom)).astype(o_ref.dtype)


def prepare_head_params(head_w, head_b):
    """One-time prep of nn.Linear(512, C) params for the Pallas head.

    Pads the class axis to a lane-dense multiple of 128 (padded classes get a
    -1e30 bias so softmax gives them zero mass) and casts the matmul operand to
    bf16.  Hoisted out of the per-forward path.  The bias stays f32 so the
    -1e30 pad sentinel is represented exactly.
    """
    if head_b.ndim == 1:
        head_b = head_b[None, :]
    C = head_w.shape[1]
    C_pad = max(_round_up(C, _LANE), _LANE)
    if C_pad != C:
        head_w = jnp.pad(head_w, ((0, 0), (0, C_pad - C)))
        head_b = jnp.pad(head_b, ((0, 0), (0, C_pad - C)), constant_values=-1e30)
    return head_w.astype(jnp.bfloat16), head_b.astype(jnp.float32)


def classifier_head(features, w_padded, b_padded, *, num_classes,
                    block_b=2048, out_dtype=jnp.bfloat16):
    """features (B, 512) x prepared head params -> softmax probs (B, num_classes)."""
    B, F = features.shape
    Fw, C_pad = w_padded.shape
    assert Fw == F and C_pad % _LANE == 0, "run prepare_head_params() first"

    # ---- batch tiling: balanced tiles bound padding; >=2 tiles feeds both
    # v7x TensorCores once the batch is big enough to be worth splitting
    # (no effect on single-TC v5e / v6e beyond a little extra pipelining). ----
    n_tiles = pl.cdiv(B, block_b)
    if n_tiles < 2 and B >= 256:
        n_tiles = 2
    TB = min(block_b, _round_up(pl.cdiv(B, n_tiles), _SUBLANE))

    # ---- VMEM plan: double-buffered feature/output tiles + resident weight ---
    w_bytes = F * C_pad * 2                            # bf16 resident weight
    single_buffer_resident = w_bytes >= (2 << 20)      # only force when it matters
    resident_bytes = (w_bytes + C_pad * 4) * (1 if single_buffer_resident else 2)
    row_bytes = 2 * (F * jnp.dtype(features.dtype).itemsize
                     + C_pad * jnp.dtype(out_dtype).itemsize)
    avail = _VMEM_LIMIT - resident_bytes - (4 << 20)   # pipeline slack
    if avail >= row_bytes * _SUBLANE:
        TB = min(TB, (avail // row_bytes) // _SUBLANE * _SUBLANE)
    # TODO(synk): for very large class counts (C_pad ~16K+) the resident weight
    # alone approaches v7x's 64 MiB VMEM; add a class-axis grid dimension with a
    # two-pass / online softmax instead of holding the whole class row in VMEM.

    B_pad = _round_up(B, TB)
    if B_pad != B:
        features = jnp.pad(features, ((0, B_pad - B), (0, 0)))
    grid = (B_pad // TB,)

    # constant-index weight/bias never change between grid steps -> single
    # buffer them once they are big (saves VMEM; irrelevant at C_pad=128).
    resident_mode = (dict(pipeline_mode=pl.Buffered(1))
                     if single_buffer_resident else {})

    out = pl.pallas_call(
        _classifier_head_kernel,
        out_shape=jax.ShapeDtypeStruct((B_pad, C_pad), out_dtype),
        grid_spec=pltpu.PrefetchScalarGridSpec(
            num_scalar_prefetch=0,
            grid=grid,
            in_specs=[
                # feature tile: streamed & double-buffered along the batch grid
                pl.BlockSpec((TB, F), lambda i: (i, 0)),
                # weight / bias: constant index_map -> VMEM-resident across tiles
                pl.BlockSpec((F, C_pad), lambda i: (0, 0), **resident_mode),
                pl.BlockSpec((1, C_pad), lambda i: (0, 0), **resident_mode),
            ],
            out_specs=pl.BlockSpec((TB, C_pad), lambda i: (i, 0)),
        ),
        compiler_params=pltpu.CompilerParams(
            # batch tiles are independent -> shard across v7x's two TensorCores
            dimension_semantics=("parallel",),
            vmem_limit_bytes=_VMEM_LIMIT,
        ),
    )(features, w_padded, b_padded)

    if B_pad == B and C_pad == num_classes:
        return out                                   # no extra HBM slice pass
    return out[:B, :num_classes]


def encoder_stub(x, proj_w, proj_b):
    """Deterministic frozen-encoder stand-in: GAP over HW, then Linear C->512.

    TODO(synk): the real `encoder` is an arbitrary externally supplied nn.Module
    (e.g. a ResNet-18 trunk) not defined in the reference module, so this
    GAP+Linear stand-in is glue, not spec.  If the real encoder is JAX-visible,
    fuse its final 512-d projection into the Pallas head (pass pre-projection
    activations + both weight matrices) so the (B, 512) feature tensor never
    round-trips HBM -- the biggest remaining lever for this HBM-bound kernel.
    """
    pooled = jnp.mean(x, axis=(2, 3))                # (B, C)
    feats = pooled @ proj_w + proj_b                 # (B, 512)
    return jax.lax.stop_gradient(feats)              # mirrors torch.no_grad()


@functools.partial(jax.jit, static_argnames=("num_classes",))
def classifier_forward(x, enc_w, enc_b, head_w_p, head_b_p, *, num_classes):
    feats = encoder_stub(x, enc_w, enc_b)
    # hand the head bf16 features: the cast fuses into the encoder's epilogue,
    # so the feature tensor round-trips HBM once, in bf16 (no extra copy pass).
    return classifier_head(feats.astype(jnp.bfloat16), head_w_p, head_b_p,
                           num_classes=num_classes)


def init_params(key, in_channels, out_features):
    k1, k2, k3, k4 = jax.random.split(key, 4)
    enc_w = jax.random.normal(k1, (in_channels, FEATURE_DIM), jnp.float32) * 0.1
    enc_b = jax.random.normal(k2, (FEATURE_DIM,), jnp.float32) * 0.01
    # nn.Linear(512, out_features): torch stores weight (out, in); kept transposed.
    head_w = jax.random.normal(k3, (FEATURE_DIM, out_features), jnp.float32) * 0.05
    head_b = jax.random.normal(k4, (1, out_features), jnp.float32) * 0.01
    return {"enc_w": enc_w, "enc_b": enc_b, "head_w": head_w, "head_b": head_b}


if __name__ == "__main__":
    B, C_IN, H, W = 8, 4, 16, 16
    OUT_FEATURES = 16

    key = jax.random.PRNGKey(0)
    kx, kp = jax.random.split(key)
    x = jax.random.normal(kx, (B, C_IN, H, W), jnp.float32)   # NCHW like torch
    params = init_params(kp, C_IN, OUT_FEATURES)

    # one-time head-param prep (padding + bf16 cast hoisted out of the forward)
    head_w_p, head_b_p = prepare_head_params(params["head_w"], params["head_b"])

    probs = jax.block_until_ready(
        classifier_forward(x, params["enc_w"], params["enc_b"],
                           head_w_p, head_b_p, num_classes=OUT_FEATURES))

    # Reference in plain JAX with the same bf16 matmul operands.
    feats_ref = encoder_stub(x, params["enc_w"], params["enc_b"])
    logits_ref = jnp.dot(feats_ref.astype(jnp.bfloat16),
                         params["head_w"].astype(jnp.bfloat16),
                         preferred_element_type=jnp.float32) + params["head_b"]
    probs_ref = jax.nn.softmax(logits_ref, axis=1)

    assert probs.shape == (B, OUT_FEATURES)
    assert probs.dtype == jnp.bfloat16
    p32 = probs.astype(jnp.float32)
    # bf16 matmul operands + bf16 output -> a few e-3; tolerances account for it.
    assert jnp.allclose(p32, probs_ref, atol=1e-2, rtol=2e-2)
    assert jnp.allclose(jnp.sum(p32, axis=1), 1.0, atol=2e-2)

    print("KERNEL_OK")
</pallas_src>

<mosaic_0001>
module attributes {stable_mosaic.version = 11 : i64} {
  func.func @_classifier_head_kernel(%arg0: i32, %arg1: memref<16x512xbf16, #tpu.memory_space<vmem>>, %arg2: memref<512x128xbf16, #tpu.memory_space<vmem>>, %arg3: memref<1x128xf32, #tpu.memory_space<vmem>>, %arg4: memref<16x128xbf16, #tpu.memory_space<vmem>>) attributes {dimension_semantics = [#tpu.dimension_semantics<parallel>], iteration_bounds = array<i64: 1>, scalar_prefetch = 0 : i64, scratch_operands = 0 : i64, tpu.core_type = #tpu.core_type<tc>, window_params = [{transform_indices = @transform_0, window_bounds = array<i64: 16, 512>}, {pipeline_mode = #tpu.pipeline_mode<synchronous>, transform_indices = @transform_1, window_bounds = array<i64: 512, 128>}, {pipeline_mode = #tpu.pipeline_mode<synchronous>, transform_indices = @transform_2, window_bounds = array<i64: 1, 128>}, {transform_indices = @transform_3, window_bounds = array<i64: 16, 128>}]} {
    %c0 = arith.constant 0 : index
    %c0_0 = arith.constant 0 : index
    %0 = vector.load %arg1[%c0, %c0_0] : memref<16x512xbf16, #tpu.memory_space<vmem>>, vector<16x512xbf16>
    %c0_1 = arith.constant 0 : index
    %c0_2 = arith.constant 0 : index
    %1 = vector.load %arg2[%c0_1, %c0_2] : memref<512x128xbf16, #tpu.memory_space<vmem>>, vector<512x128xbf16>
    %cst = arith.constant dense<0.000000e+00> : vector<16x128xf32>
    %2 = tpu.matmul %0, %1, %cst {dimension_numbers = #tpu.dot_dimension_numbers<[1], [0], [0], [1], [0, 0, 1, 1], [], []>} : vector<16x512xbf16>, vector<512x128xbf16>, vector<16x128xf32> -> vector<16x128xf32>
    %c0_3 = arith.constant 0 : index
    %c0_4 = arith.constant 0 : index
    %3 = vector.load %arg3[%c0_3, %c0_4] : memref<1x128xf32, #tpu.memory_space<vmem>>, vector<1x128xf32>
    %4 = vector.broadcast %3 : vector<1x128xf32> to vector<16x128xf32>
    %5 = arith.addf %2, %4 : vector<16x128xf32>
    %cst_5 = arith.constant dense<0xFF800000> : vector<16xf32>
    %6 = vector.multi_reduction <maximumf>, %5, %cst_5 [1] : vector<16x128xf32> to vector<16xf32>
    %7 = vector.shape_cast %6 : vector<16xf32> to vector<16x1xf32>
    %8 = vector.broadcast %7 : vector<16x1xf32> to vector<16x128xf32>
    %9 = arith.subf %5, %8 : vector<16x128xf32>
    %10 = math.exp %9 : vector<16x128xf32>
    %cst_6 = arith.constant dense<0.000000e+00> : vector<16xf32>
    %11 = vector.multi_reduction <add>, %10, %cst_6 [1] : vector<16x128xf32> to vector<16xf32>
    %12 = vector.shape_cast %11 : vector<16xf32> to vector<16x1xf32>
    %13 = tpu.reciprocal %12 : vector<16x1xf32> -> vector<16x1xf32>
    %14 = vector.broadcast %13 : vector<16x1xf32> to vector<16x128xf32>
    %15 = arith.mulf %10, %14 : vector<16x128xf32>
    %16 = arith.truncf %15 : vector<16x128xf32> to vector<16x128xbf16>
    %c0_7 = arith.constant 0 : index
    %c0_8 = arith.constant 0 : index
    %17 = vector.load %arg4[%c0_7, %c0_8] : memref<16x128xbf16, #tpu.memory_space<vmem>>, vector<16x128xbf16>
    tpu.vector_store %arg4[%c0_7, %c0_8], %16 {strides = array<i32>} : memref<16x128xbf16, #tpu.memory_space<vmem>>, vector<16x128xbf16>,
    return
  }
  func.func @transform_0(%arg0: i32) -> (i32, i32) {
    %c0_i32 = arith.constant 0 : i32
    %c0_i32_0 = arith.constant 0 : i32
    return %arg0, %c0_i32 : i32, i32
  }
  func.func @transform_1(%arg0: i32) -> (i32, i32) {
    %c0_i32 = arith.constant 0 : i32
    %c0_i32_0 = arith.constant 0 : i32
    %c0_i32_1 = arith.constant 0 : i32
    return %c0_i32, %c0_i32_0 : i32, i32
  }
  func.func @transform_2(%arg0: i32) -> (i32, i32) {
    %c0_i32 = arith.constant 0 : i32
    %c0_i32_0 = arith.constant 0 : i32
    %c0_i32_1 = arith.constant 0 : i32
    return %c0_i32, %c0_i32_0 : i32, i32
  }
  func.func @transform_3(%arg0: i32) -> (i32, i32) {
    %c0_i32 = arith.constant 0 : i32
    %c0_i32_0 = arith.constant 0 : i32
    return %arg0, %c0_i32 : i32, i32
  }
}

</mosaic_0001>

<bundles_post_ra>
// kernel: classifier_forward.1
= control target key start
LH: loop header
LB: loop body
LE: loop exit
PB: predicated region body
PF: predicated region fallthrough
CT: control target
= control target key end

     0   :  { %s686_s1 = inlined_call_operand.vmem [shape: bf16[512,128], index: 1, kind: input, shape index: {}]   ;;  %s687_s0 = inlined_call_operand.vmem [shape: bf16[16,512], index: 0, kind: input, shape index: {}]   ;;  %s688_s2 = inlined_call_operand.vmem [shape: f32[1,128], index: 2, kind: input, shape index: {}]   ;;  %s689_s3 = inlined_call_operand.vmem [shape: bf16[16,128], index: 3, kind: output, shape index: {}]  }
   0x1   :  { %v506_v0 = vld [vmem:[%s686_s1 + $0x40] sm:$0xff]   ;;  %v510_v4 = vld [vmem:[%s686_s1 + $0x48] sm:$0xff]   ;;  %v514_v8 = vld [vmem:[%s686_s1 + $0x50] sm:$0xff]  }
   0x2   :  { %v507_v1 = vld [vmem:[%s686_s1 + $0xc0] sm:$0xff]   ;;  %462 = vmatprep.subr.bf16.mxu0 %v506_v0  ;;  %v511_v5 = vld [vmem:[%s686_s1 + $0xc8] sm:$0xff]   ;;  %v515_v9 = vld [vmem:[%s686_s1 + $0xd0] sm:$0xff]  }
   0x3   :  { %v508_v2 = vld [vmem:[%s686_s1] sm:$0xff]   ;;  %484 = vmatprep.subr.bf16.mxu1 %v507_v1  ;;  %v512_v6 = vld [vmem:[%s686_s1 + $0x8] sm:$0xff]   ;;  %v516_v10 = vld [vmem:[%s686_s1 + $0x10] sm:$0xff]  }
   0x4   :  { %v509_v3 = vld [vmem:[%s686_s1 + $0x80] sm:$0xff]   ;;  %463 = vmatpush3.bf16.msra.mxu0 %v508_v2  ;;  %v513_v7 = vld [vmem:[%s686_s1 + $0x88] sm:$0xff]   ;;  %v517_v11 = vld [vmem:[%s686_s1 + $0x90] sm:$0xff]  }
   0x5   :  { %485 = vmatpush3.bf16.msra.mxu1 %v509_v3  ;;  %464 = vmatprep.subr.bf16.mxu0 %v510_v4  ;;  %v518_v12 = vld [vmem:[%s686_s1 + $0x58] sm:$0xff]   ;;  %v522_v16 = vld [vmem:[%s686_s1 + $0x60] sm:$0xff]   ;;  %v526_v20 = vld [vmem:[%s686_s1 + $0x68] sm:$0xff]  }
   0x6   :  { %486 = vmatprep.subr.bf16.mxu1 %v511_v5  ;;  %v519_v13 = vld [vmem:[%s686_s1 + $0xd8] sm:$0xff]   ;;  %v523_v17 = vld [vmem:[%s686_s1 + $0xe0] sm:$0xff]   ;;  %v527_v21 = vld [vmem:[%s686_s1 + $0xe8] sm:$0xff]  }
   0x7   :  { %v520_v14 = vld [vmem:[%s686_s1 + $0x18] sm:$0xff]   ;;  %v524_v18 = vld [vmem:[%s686_s1 + $0x20] sm:$0xff]   ;;  %v528_v22 = vld [vmem:[%s686_s1 + $0x28] sm:$0xff]  }
   0x8   :  { %465 = vmatpush3.bf16.msra.mxu0 %v512_v6  ;;  %v521_v15 = vld [vmem:[%s686_s1 + $0x98] sm:$0xff]   ;;  %v525_v19 = vld [vmem:[%s686_s1 + $0xa0] sm:$0xff]   ;;  %v529_v23 = vld [vmem:[%s686_s1 + $0xa8] sm:$0xff]  }
   0x9   :  { %487 = vmatpush3.bf16.msra.mxu1 %v513_v7  ;;  %466 = vmatprep.subr.bf16.mxu0 %v514_v8  ;;  %v530_v24 = vld [vmem:[%s686_s1 + $0x70] sm:$0xff]   ;;  %v534_v28 = vld [vmem:[%s686_s1 + $0x78] sm:$0xff]   ;;  %v416_v38 = vld [vmem:[%s688_s2] ss:$0 sm:$0xff] }
   0xa   :  { %488 = vmatprep.subr.bf16.mxu1 %v515_v9  ;;  %v531_v25 = vld [vmem:[%s686_s1 + $0xf0] sm:$0xff]   ;;  %v535_v29 = vld [vmem:[%s686_s1 + $0xf8] sm:$0xff]  }
   0xb   :  { %v532_v26 = vld [vmem:[%s686_s1 + $0x30] sm:$0xff]   ;;  %v536_v30 = vld [vmem:[%s686_s1 + $0x38] sm:$0xff]  }
   0xc   :  { %467 = vmatpush3.bf16.msra.mxu0 %v516_v10  ;;  %v533_v27 = vld [vmem:[%s686_s1 + $0xb0] sm:$0xff]   ;;  %v537_v31 = vld [vmem:[%s686_s1 + $0xb8] sm:$0xff]  }
   0xd   :  { %489 = vmatpush3.bf16.msra.mxu1 %v517_v11  ;;  %468 = vmatprep.subr.bf16.mxu0 %v518_v12  ;;  %v538_v32 = vld [vmem:[%s687_s0] ss:$16 sps:$4 sm:$0xff]   ;;  %v540_v33 = vld [vmem:[%s687_s0 + $0x4] ss:$16 sps:$4 sm:$0xff]   ;;  %v541_v34 = vld [vmem:[%s687_s0 + $0x8] ss:$16 sps:$4 sm:$0xff]  }
   0xe   :  { %490 = vmatprep.subr.bf16.mxu1 %v519_v13  ;;  %v543_v35 = vld [vmem:[%s687_s0 + $0xc] ss:$16 sps:$4 sm:$0xff]   ;;  %334 = vmatprep.mubr.bf16.mxu0 %v540_v33 }
   0xf   :  { %375 = vmatprep.mubr.bf16.mxu1 %v543_v35 }
  0x10   :  { %469 = vmatpush3.bf16.msra.mxu0 %v520_v14 }
  0x11   :  { %491 = vmatpush3.bf16.msra.mxu1 %v521_v15  ;;  %470 = vmatprep.subr.bf16.mxu0 %v522_v16 }
  0x12   :  { %492 = vmatprep.subr.bf16.mxu1 %v523_v17 }
  0x14   :  { %471 = vmatpush3.bf16.msra.mxu0 %v524_v18 }
  0x15   :  { %493 = vmatpush3.bf16.msra.mxu1 %v525_v19  ;;  %472 = vmatprep.subr.bf16.mxu0 %v526_v20 }
  0x16   :  { %494 = vmatprep.subr.bf16.mxu1 %v527_v21 }
  0x18   :  { %473 = vmatpush3.bf16.msra.mxu0 %v528_v22 }
  0x19   :  { %495 = vmatpush3.bf16.msra.mxu1 %v529_v23  ;;  %474 = vmatprep.subr.bf16.mxu0 %v530_v24 }
  0x1a   :  { %496 = vmatprep.subr.bf16.mxu1 %v531_v25 }
  0x1c   :  { %475 = vmatpush3.bf16.msra.mxu0 %v532_v26 }
  0x1d   :  { %497 = vmatpush3.bf16.msra.mxu1 %v533_v27  ;;  %476 = vmatprep.subr.bf16.mxu0 %v534_v28 }
  0x1e   :  { %498 = vmatprep.subr.bf16.mxu1 %v535_v29 }
  0x20   :  { %477 = vmatpush3.bf16.msra.mxu0 %v536_v30 }
  0x21   :  { %499 = vmatpush3.bf16.msra.mxu1 %v537_v31 }
  0x23   :  { %335 = vmatmul.mubr.bf16.vlgmr.msra.gmra.mrb[0].mxu0 %v538_v32 }
  0x24   :  { %376 = vmatmul.mubr.bf16.vlgmr.msra.gmra.mrb[0].mxu1 %v541_v34 }
  0xf6   :  { %v478_v36 = vpop.f32.mrb[0].mxu0 }
  0xf7   :  { %v500_v37 = vpop.f32.mrb[0].mxu1  ;;  %v479_v39 = vpop.f32.mrb[1].mxu0 }
  0xf8   :  { %v480_v40 = vadd.f32 %v479_v39, %v478_v36  ;;  %v501_v41 = vpop.f32.mrb[1].mxu1  ;;  %v481_v42 = vpop.f32.mrb[2].mxu0 }
  0xf9   :  { %v502_v43 = vadd.f32 %v501_v41, %v500_v37  ;;  %v503_v44 = vpop.f32.mrb[2].mxu1  ;;  %v482_v45 = vpop.f32.mrb[3].mxu0 }
  0xfa   :  { %v337_v46 = vadd.f32 %v480_v40, %v416_v38  ;;  %v483_v47 = vadd.f32 %v482_v45, %v481_v42  ;;  %v504_v48 = vpop.f32.mrb[3].mxu1 }
  0xfb   :  { %v505_v49 = vadd.f32 %v504_v48, %v503_v44 }
  0xfc   :  { %v340_v50 = vadd.f32 %v483_v47, %v416_v38  ;;  %v378_v51 = vadd.f32 %v502_v43, %v337_v46 }
  0xfe   :  { %384 = vmax.xlane.f32.xlu0 %v378_v51  ;;  %v381_v52 = vadd.f32 %v505_v49, %v340_v50 }
 0x102   :  { %386 = vmax.xlane.f32.xlu0 %v381_v52 }
 0x18b   :  { %v385_v53 = vpop.xlane.xlu0 %384 }
 0x18c   :  { %v388_v54 = vsub.f32 %v378_v51, %v385_v53 }
 0x18e   :  { %v390_v55 = vmul.f32 1.442695, %v388_v54 }
 0x18f   :  { %v387_v56 = vpop.xlane.xlu0 %386 }
 0x190   :  { %544 = vpow2.f32 %v390_v55  ;;  %v389_v57 = vsub.f32 %v381_v52, %v387_v56 }
 0x192   :  { %v392_v58 = vmul.f32 1.442695, %v389_v57 }
 0x194   :  { %546 = vpow2.f32 %v392_v58 }
 0x19a   :  { %v545_v59 = vpop.eup %544 }
 0x19b   :  { %394 = vadd.xlane.f32.xlu1 %v545_v59 }
 0x19e   :  { %v547_v60 = vpop.eup %546 }
 0x19f   :  { %396 = vadd.xlane.f32.xlu1 %v547_v60 }
 0x228   :  { %v395_v61 = vpop.xlane.xlu1 %394 }
 0x229   :  { %548 = vrcp.f32 %v395_v61 }
 0x22c   :  { %v397_v62 = vpop.xlane.xlu1 %396 }
 0x22d   :  { %550 = vrcp.f32 %v397_v62 }
 0x233   :  { %v549_v63 = vpop.eup %548 }
 0x234   :  { %v400_v1 = vmul.f32 %v549_v63, %v545_v59 }
 0x237   :  { %v551_v0 = vpop.eup %550 }
 0x238   :  { %v401_v2 = vmul.f32 %v551_v0, %v547_v60 }
 0x23a   :  { %v460_v3 = vpack.c.bf16 %v401_v2, %v400_v1 }
 0x23c   :  { %461 = vst [vmem:[%s689_s3] sm:$0xff] %v460_v3  }

</bundles_post_ra>
